<compile_context>
chip_gen: v7x
topology: tpu7x:2x2x1
jax: 0.10.0
libtpu: 0.0.40
codegen_flags: <defaults>
</compile_context>

<pallas_src>
import jax
import jax.numpy as jnp
from jax.experimental import pallas as pl
from jax.experimental.pallas import tpu as pltpu

_BN_EPS = 1e-5
_LANES = 128


def _round_up(n, m):
    return ((n + m - 1) // m) * m


# ----------------------------- Fused Pallas kernel -------------------------- #
_KERNEL_CACHE = {}


def _make_fused_kernel(n_hidden):
    """kernel(x, w_0..w_{n-1}, mu_w, vecs, out): whole MLP fused in VMEM."""
    if n_hidden in _KERNEL_CACHE:
        return _KERNEL_CACHE[n_hidden]

    def kernel(x_ref, *rest):
        o_ref = rest[-1]
        vecs_ref = rest[-2]                # (2*n_hidden + 1, max_out_pad)
        mu_w_ref = rest[-3]
        w_refs = rest[:-3]

        x = x_ref[...]                                         # (B, state_dim)
        for i, w_ref in enumerate(w_refs):                     # unrolled at trace time
            w = w_ref[...]                                     # (in_dim_i, out_pad_i)
            out_pad = w.shape[1]
            g = vecs_ref[2 * i:2 * i + 1, :out_pad]            # (1, out_pad)
            beta = vecs_ref[2 * i + 1:2 * i + 2, :out_pad]     # (1, out_pad)
            # Linear (bias omitted: it cancels exactly under training-mode BN).
            y = jnp.dot(x, w, preferred_element_type=jnp.float32)
            # BatchNorm1d (training mode): batch mean + biased variance, two-pass.
            mean = jnp.mean(y, axis=0, keepdims=True)
            centered = y - mean
            var = jnp.mean(centered * centered, axis=0, keepdims=True)
            scale = g * jax.lax.rsqrt(var + _BN_EPS)           # row-level gamma fold
            x = jnp.maximum(centered * scale + beta, 0.0)      # affine + ReLU
        mu_w = mu_w_ref[...]
        mu_b = vecs_ref[2 * len(w_refs):2 * len(w_refs) + 1, :mu_w.shape[1]]
        out = jnp.dot(x, mu_w, preferred_element_type=jnp.float32) + mu_b
        o_ref[...] = out.astype(o_ref.dtype)                   # lane-dense store

    _KERNEL_CACHE[n_hidden] = kernel
    return kernel


# ------------------------------ Wrapper ------------------------------------- #
def igl_mlp_forward(state, params):
    """state: (B, state_dim) f32 -> (B, next_state_dim) f32."""
    _, next_state_dim, _ = params["dims"]
    B = state.shape[0]
    w_list = params["w_padded"]
    mu_w = params["mu_w_padded"]
    vecs = params["vecs"]
    out_pad = mu_w.shape[1]

    kernel = _make_fused_kernel(len(w_list))
    out = pl.pallas_call(
        kernel,
        out_shape=jax.ShapeDtypeStruct((B, out_pad), jnp.float32),
        compiler_params=pltpu.CompilerParams(
            vmem_limit_bytes=32 * 1024 * 1024,   # safe on v5e/v6e/v7x
        ),
    )(state, *w_list, mu_w, vecs)
    return out[:, :next_state_dim]


# --------------------------- Parameter creation ----------------------------- #
def init_igl_mlp_params(key, state_dim, next_state_dim, hidden_dim):
    """Synthetic params: PyTorch-shaped 'logical' copies + pre-padded kernel copies."""
    sizes = [state_dim] + list(hidden_dim)
    hidden_logical, w_padded, vec_rows, out_pads = [], [], [], []
    for j in range(len(sizes) - 1):
        key, kw, kb = jax.random.split(key, 3)
        fan_in, fan_out = sizes[j], sizes[j + 1]
        bound = 1.0 / (fan_in ** 0.5)
        w = jax.random.uniform(kw, (fan_in, fan_out), jnp.float32, -bound, bound)
        b = jax.random.uniform(kb, (fan_out,), jnp.float32, -bound, bound)  # reference only
        gamma = jnp.ones((fan_out,), jnp.float32)    # BatchNorm1d weight init
        beta = jnp.zeros((fan_out,), jnp.float32)    # BatchNorm1d bias init
        hidden_logical.append((w, b, gamma, beta))

        out_pad = _round_up(fan_out, _LANES)
        out_pads.append(out_pad)
        # First layer keeps K = state_dim (the wrapper passes unpadded state);
        # later layers consume the previous layer's lane-padded activations.
        in_dim = fan_in if j == 0 else _round_up(fan_in, _LANES)
        w_padded.append(jnp.pad(w, ((0, in_dim - fan_in), (0, out_pad - fan_out))))
        # Padded gamma/beta are ZERO so padded lanes stay exactly 0 after BN+ReLU.
        vec_rows.append(jnp.pad(gamma, (0, out_pad - fan_out)))
        vec_rows.append(jnp.pad(beta, (0, out_pad - fan_out)))

    key, kw, kb = jax.random.split(key, 3)
    fan_in = hidden_dim[-1]
    bound = 1.0 / (fan_in ** 0.5)
    mu_w = jax.random.uniform(kw, (fan_in, next_state_dim), jnp.float32, -bound, bound)
    mu_b = jax.random.uniform(kb, (next_state_dim,), jnp.float32, -bound, bound)

    mu_in_pad = _round_up(fan_in, _LANES)
    mu_out_pad = _round_up(next_state_dim, _LANES)
    mu_w_p = jnp.pad(mu_w, ((0, mu_in_pad - fan_in), (0, mu_out_pad - next_state_dim)))
    vec_rows.append(jnp.pad(mu_b, (0, mu_out_pad - next_state_dim)))

    # Pack all small per-layer vectors into one lane-dense (2*n_hidden+1, max_pad) array.
    max_pad = max(out_pads + [mu_out_pad])
    vecs = jnp.stack([jnp.pad(r, (0, max_pad - r.shape[0])) for r in vec_rows])

    return {
        "w_padded": w_padded,
        "mu_w_padded": mu_w_p,
        "vecs": vecs,
        "hidden": hidden_logical,          # for the pure-JAX reference only
        "mu": (mu_w, mu_b),
        "dims": (state_dim, next_state_dim, list(hidden_dim)),
    }


# -------------------------------- Main -------------------------------------- #
if __name__ == "__main__":
    state_dim = 32
    next_state_dim = 16
    hidden_dim = [64, 64]
    batch = 8

    key = jax.random.PRNGKey(0)
    key, kx = jax.random.split(key)
    state = jax.random.normal(kx, (batch, state_dim), jnp.float32)

    params = init_igl_mlp_params(key, state_dim, next_state_dim, hidden_dim)

    mean = igl_mlp_forward(state, params)
    jax.block_until_ready(mean)

    # Pure-JAX reference on the un-padded logical params (Linear bias included;
    # it cancels under training-mode BN, so the bias-free kernel must match).
    def ref_forward(x, params):
        for (w, b, g, beta) in params["hidden"]:
            y = x @ w + b
            m = jnp.mean(y, axis=0, keepdims=True)
            v = jnp.mean((y - m) ** 2, axis=0, keepdims=True)   # biased variance
            x = jnp.maximum(g * (y - m) * jax.lax.rsqrt(v + _BN_EPS) + beta, 0.0)
        mu_w, mu_b = params["mu"]
        return x @ mu_w + mu_b

    ref = ref_forward(state, params)
    assert mean.shape == (batch, next_state_dim)
    assert jnp.allclose(mean, ref, atol=1e-4, rtol=1e-4)

    print("KERNEL_OK")
</pallas_src>

<mosaic_0001>
module attributes {stable_mosaic.version = 11 : i64} {
  func.func @kernel(%arg0: memref<8x32xf32, #tpu.memory_space<vmem>>, %arg1: memref<32x128xf32, #tpu.memory_space<vmem>>, %arg2: memref<128x128xf32, #tpu.memory_space<vmem>>, %arg3: memref<128x128xf32, #tpu.memory_space<vmem>>, %arg4: memref<5x128xf32, #tpu.memory_space<vmem>>, %arg5: memref<8x128xf32, #tpu.memory_space<vmem>>) attributes {dimension_semantics = [], scalar_prefetch = 0 : i64, scratch_operands = 0 : i64, tpu.core_type = #tpu.core_type<tc>} {
    %c0 = arith.constant 0 : index
    %c0_0 = arith.constant 0 : index
    %0 = vector.load %arg0[%c0, %c0_0] : memref<8x32xf32, #tpu.memory_space<vmem>>, vector<8x32xf32>
    %c0_1 = arith.constant 0 : index
    %c0_2 = arith.constant 0 : index
    %1 = vector.load %arg1[%c0_1, %c0_2] : memref<32x128xf32, #tpu.memory_space<vmem>>, vector<32x128xf32>
    %c0_3 = arith.constant 0 : index
    %c0_4 = arith.constant 0 : index
    %2 = vector.load %arg4[%c0_3, %c0_4] : memref<5x128xf32, #tpu.memory_space<vmem>>, vector<1x128xf32>
    %c1 = arith.constant 1 : index
    %c0_5 = arith.constant 0 : index
    %3 = vector.load %arg4[%c1, %c0_5] : memref<5x128xf32, #tpu.memory_space<vmem>>, vector<1x128xf32>
    %cst = arith.constant dense<0.000000e+00> : vector<8x128xf32>
    %4 = tpu.matmul %0, %1, %cst {dimension_numbers = #tpu.dot_dimension_numbers<[1], [0], [0], [1], [0, 0, 1, 1], [], []>} : vector<8x32xf32>, vector<32x128xf32>, vector<8x128xf32> -> vector<8x128xf32>
    %cst_6 = arith.constant dense<0.000000e+00> : vector<128xf32>
    %5 = vector.multi_reduction <add>, %4, %cst_6 [0] : vector<8x128xf32> to vector<128xf32>
    %6 = vector.shape_cast %5 : vector<128xf32> to vector<1x128xf32>
    %cst_7 = arith.constant 8.000000e+00 : f32
    %7 = vector.broadcast %cst_7 : f32 to vector<1x128xf32>
    %8 = arith.divf %6, %7 : vector<1x128xf32>
    %9 = vector.broadcast %8 : vector<1x128xf32> to vector<8x128xf32>
    %10 = arith.subf %4, %9 : vector<8x128xf32>
    %11 = arith.mulf %10, %10 : vector<8x128xf32>
    %cst_8 = arith.constant dense<0.000000e+00> : vector<128xf32>
    %12 = vector.multi_reduction <add>, %11, %cst_8 [0] : vector<8x128xf32> to vector<128xf32>
    %13 = vector.shape_cast %12 : vector<128xf32> to vector<1x128xf32>
    %cst_9 = arith.constant 8.000000e+00 : f32
    %14 = vector.broadcast %cst_9 : f32 to vector<1x128xf32>
    %15 = arith.divf %13, %14 : vector<1x128xf32>
    %cst_10 = arith.constant 9.99999974E-6 : f32
    %16 = vector.broadcast %cst_10 : f32 to vector<1x128xf32>
    %17 = arith.addf %15, %16 : vector<1x128xf32>
    %18 = math.rsqrt %17 : vector<1x128xf32>
    %19 = arith.mulf %2, %18 : vector<1x128xf32>
    %20 = vector.broadcast %19 : vector<1x128xf32> to vector<8x128xf32>
    %21 = arith.mulf %10, %20 : vector<8x128xf32>
    %22 = vector.broadcast %3 : vector<1x128xf32> to vector<8x128xf32>
    %23 = arith.addf %21, %22 : vector<8x128xf32>
    %cst_11 = arith.constant 0.000000e+00 : f32
    %24 = vector.broadcast %cst_11 : f32 to vector<8x128xf32>
    %25 = arith.maximumf %23, %24 : vector<8x128xf32>
    %c0_12 = arith.constant 0 : index
    %c0_13 = arith.constant 0 : index
    %26 = vector.load %arg2[%c0_12, %c0_13] : memref<128x128xf32, #tpu.memory_space<vmem>>, vector<128x128xf32>
    %c2 = arith.constant 2 : index
    %c0_14 = arith.constant 0 : index
    %27 = vector.load %arg4[%c2, %c0_14] : memref<5x128xf32, #tpu.memory_space<vmem>>, vector<1x128xf32>
    %c3 = arith.constant 3 : index
    %c0_15 = arith.constant 0 : index
    %28 = vector.load %arg4[%c3, %c0_15] : memref<5x128xf32, #tpu.memory_space<vmem>>, vector<1x128xf32>
    %cst_16 = arith.constant dense<0.000000e+00> : vector<8x128xf32>
    %29 = tpu.matmul %25, %26, %cst_16 {dimension_numbers = #tpu.dot_dimension_numbers<[1], [0], [0], [1], [0, 0, 1, 1], [], []>} : vector<8x128xf32>, vector<128x128xf32>, vector<8x128xf32> -> vector<8x128xf32>
    %cst_17 = arith.constant dense<0.000000e+00> : vector<128xf32>
    %30 = vector.multi_reduction <add>, %29, %cst_17 [0] : vector<8x128xf32> to vector<128xf32>
    %31 = vector.shape_cast %30 : vector<128xf32> to vector<1x128xf32>
    %cst_18 = arith.constant 8.000000e+00 : f32
    %32 = vector.broadcast %cst_18 : f32 to vector<1x128xf32>
    %33 = arith.divf %31, %32 : vector<1x128xf32>
    %34 = vector.broadcast %33 : vector<1x128xf32> to vector<8x128xf32>
    %35 = arith.subf %29, %34 : vector<8x128xf32>
    %36 = arith.mulf %35, %35 : vector<8x128xf32>
    %cst_19 = arith.constant dense<0.000000e+00> : vector<128xf32>
    %37 = vector.multi_reduction <add>, %36, %cst_19 [0] : vector<8x128xf32> to vector<128xf32>
    %38 = vector.shape_cast %37 : vector<128xf32> to vector<1x128xf32>
    %cst_20 = arith.constant 8.000000e+00 : f32
    %39 = vector.broadcast %cst_20 : f32 to vector<1x128xf32>
    %40 = arith.divf %38, %39 : vector<1x128xf32>
    %cst_21 = arith.constant 9.99999974E-6 : f32
    %41 = vector.broadcast %cst_21 : f32 to vector<1x128xf32>
    %42 = arith.addf %40, %41 : vector<1x128xf32>
    %43 = math.rsqrt %42 : vector<1x128xf32>
    %44 = arith.mulf %27, %43 : vector<1x128xf32>
    %45 = vector.broadcast %44 : vector<1x128xf32> to vector<8x128xf32>
    %46 = arith.mulf %35, %45 : vector<8x128xf32>
    %47 = vector.broadcast %28 : vector<1x128xf32> to vector<8x128xf32>
    %48 = arith.addf %46, %47 : vector<8x128xf32>
    %cst_22 = arith.constant 0.000000e+00 : f32
    %49 = vector.broadcast %cst_22 : f32 to vector<8x128xf32>
    %50 = arith.maximumf %48, %49 : vector<8x128xf32>
    %c0_23 = arith.constant 0 : index
    %c0_24 = arith.constant 0 : index
    %51 = vector.load %arg3[%c0_23, %c0_24] : memref<128x128xf32, #tpu.memory_space<vmem>>, vector<128x128xf32>
    %c4 = arith.constant 4 : index
    %c0_25 = arith.constant 0 : index
    %52 = vector.load %arg4[%c4, %c0_25] : memref<5x128xf32, #tpu.memory_space<vmem>>, vector<1x128xf32>
    %cst_26 = arith.constant dense<0.000000e+00> : vector<8x128xf32>
    %53 = tpu.matmul %50, %51, %cst_26 {dimension_numbers = #tpu.dot_dimension_numbers<[1], [0], [0], [1], [0, 0, 1, 1], [], []>} : vector<8x128xf32>, vector<128x128xf32>, vector<8x128xf32> -> vector<8x128xf32>
    %54 = vector.broadcast %52 : vector<1x128xf32> to vector<8x128xf32>
    %55 = arith.addf %53, %54 : vector<8x128xf32>
    %c0_27 = arith.constant 0 : index
    %c0_28 = arith.constant 0 : index
    %56 = vector.load %arg5[%c0_27, %c0_28] : memref<8x128xf32, #tpu.memory_space<vmem>>, vector<8x128xf32>
    tpu.vector_store %arg5[%c0_27, %c0_28], %55 {strides = array<i32>} : memref<8x128xf32, #tpu.memory_space<vmem>>, vector<8x128xf32>,
    return
  }
}

</mosaic_0001>

<bundles_post_ra>
// kernel: tpu_custom_call.1
= control target key start
LH: loop header
LB: loop body
LE: loop exit
PB: predicated region body
PF: predicated region fallthrough
CT: control target
= control target key end

     0   :  { %10 = vsyncpa [#allocation3], 0  ;;  %s875_s0 = inlined_call_operand.hbm [shape: f32[8,32], index: 0, kind: input, shape index: {}]   ;;  %s876_s1 = inlined_call_operand.hbm [shape: f32[32,128], index: 1, kind: input, shape index: {}]   ;;  %s877_s2 = inlined_call_operand.hbm [shape: f32[128,128], index: 2, kind: input, shape index: {}]   ;;  %s878_s3 = inlined_call_operand.hbm [shape: f32[128,128], index: 3, kind: input, shape index: {}]   ;;  %s879_s4 = inlined_call_operand.vmem [shape: f32[5,128], index: 4, kind: input, shape index: {}]   ;;  %s880_s5 = inlined_call_operand.hbm [shape: f32[8,128], index: 5, kind: output, shape index: {}]  }
   0x1   :  { %11 = vsyncpa [#allocation6], 0 }
   0x2   :  { %12 = vsyncpa [#allocation9], 0 }
   0x3   :  { %13 = vsyncpa [#allocation4], 0  ;;  %s723_s18 = smov [#allocation5]   ;;  %s605_s22 = scalar_lea.hbm %s876_s1, 512 }
   0x4   :  { %s29_s19 = sshll.u32 %s723_s18, 4  ;;  %p606_p0 = scmp.ne.s32.totalorder %s876_s1, %s605_s22  ;;  %s30_s19 = int_to_ptr.vmem [resolvable:$true] %s29_s19 }
   0x5   :  { %p609_p1 = scmp.lt.u32.totalorder %s605_s22, %s876_s1 }
   0x7   :  { %p611_p2 = pnand %p609_p1, %p606_p0 }
   0x9   :  { %614 = shalt.err (!%p611_p2)
}
   0xa   :  { %s615_s27 = scalar_lea.vmem %s30_s19, 512  ;;  %p620_p4 = scmp.lt.s32.totalorder %s30_s19, %s30_s19 }
   0xb   :  { %p616_p3 = scmp.ne.s32.totalorder %s30_s19, %s615_s27  ;;  %p621_p5 = scmp.lt.s32.totalorder %s615_s27, %s615_s27 }
   0xd   :  { %p622_p6 = por %p621_p5, %p620_p4 }
   0xf   :  { %p623_p7 = pnand %p622_p6, %p616_p3 }
  0x11   :  { %626 = shalt.err (!%p623_p7)
}
  0x12   :  { %s724_s28 = smov 128   ;;  %s725_s29 = smov 8  }
  0x13   :  { %35 = dma.hbm_to_vmem [thread:$0]  %s876_s1, 512, %s30_s19, [#allocation6], %s724_s28, %s724_s28, %s725_s29  }
  0x14   :  { %s726_s7 = smov [#allocation2]   ;;  %s727_s9 = smov [#allocation7]  }
  0x15   :  { %s20_s8 = sshll.u32 %s726_s7, 4  ;;  %s41_s10 = sshll.u32 %s727_s9, 4  ;;  %s21_s8 = int_to_ptr.vmem [resolvable:$true] %s20_s8  ;;  %s42_s10 = int_to_ptr.vmem [resolvable:$true] %s41_s10 }
  0x16   :  { %s627_s13 = scalar_lea.hbm %s875_s0, 128 }
  0x17   :  { %p628_p8 = scmp.ne.s32.totalorder %s875_s0, %s627_s13  ;;  %p631_p9 = scmp.lt.u32.totalorder %s627_s13, %s875_s0 }
  0x19   :  { %p633_p10 = pnand %p631_p9, %p628_p8 }
  0x1b   :  { %636 = shalt.err (!%p633_p10)
}
  0x1c   :  { %s637_s1 = scalar_lea.vmem %s21_s8, 128  ;;  %p642_p12 = scmp.lt.s32.totalorder %s21_s8, %s21_s8 }
  0x1d   :  { %p638_p11 = scmp.ne.s32.totalorder %s21_s8, %s637_s1  ;;  %p643_p13 = scmp.lt.s32.totalorder %s637_s1, %s637_s1 }
  0x1f   :  { %p644_p0 = por %p643_p13, %p642_p12 }
  0x21   :  { %p645_p1 = pnand %p644_p0, %p638_p11 }
  0x23   :  { %648 = shalt.err (!%p645_p1)
}
  0x24   :  { %23 = dma.hbm_to_vmem [thread:$0]  %s875_s0, 128, %s21_s8, [#allocation3]  }
  0x25   :  { %s649_s22 = scalar_lea.hbm %s877_s2, 2048 }
  0x26   :  { %p650_p2 = scmp.ne.s32.totalorder %s877_s2, %s649_s22  ;;  %p653_p3 = scmp.lt.u32.totalorder %s649_s22, %s877_s2 }
  0x28   :  { %p655_p4 = pnand %p653_p3, %p650_p2 }
  0x2a   :  { %658 = shalt.err (!%p655_p4)
}
  0x2b   :  { %s659_s27 = scalar_lea.vmem %s42_s10, 2048  ;;  %p664_p6 = scmp.lt.s32.totalorder %s42_s10, %s42_s10 }
  0x2c   :  { %p660_p5 = scmp.ne.s32.totalorder %s42_s10, %s659_s27  ;;  %p665_p7 = scmp.lt.s32.totalorder %s659_s27, %s659_s27 }
  0x2e   :  { %p666_p8 = por %p665_p7, %p664_p6 }
  0x30   :  { %p667_p9 = pnand %p666_p8, %p660_p5 }
  0x32   :  { %670 = shalt.err (!%p667_p9)
}
  0x33   :  { %47 = dma.hbm_to_vmem [thread:$0]  %s877_s2, 2048, %s42_s10, [#allocation6], %s724_s28, %s724_s28, %s725_s29  }
  0x34   :  { %s728_s6 = smov [#allocation8]   ;;  %s671_s11 = scalar_lea.hbm %s878_s3, 2048 }
  0x35   :  { %s53_s7 = sshll.u32 %s728_s6, 4  ;;  %p672_p10 = scmp.ne.s32.totalorder %s878_s3, %s671_s11  ;;  %s54_s7 = int_to_ptr.vmem [resolvable:$true] %s53_s7 }
  0x36   :  { %p675_p11 = scmp.lt.u32.totalorder %s671_s11, %s878_s3 }
  0x38   :  { %p677_p12 = pnand %p675_p11, %p672_p10 }
  0x3a   :  { %680 = shalt.err (!%p677_p12)
}
  0x3b   :  { %s681_s16 = scalar_lea.vmem %s54_s7, 2048  ;;  %p686_p0 = scmp.lt.s32.totalorder %s54_s7, %s54_s7 }
  0x3c   :  { %p682_p13 = scmp.ne.s32.totalorder %s54_s7, %s681_s16  ;;  %p687_p1 = scmp.lt.s32.totalorder %s681_s16, %s681_s16 }
  0x3e   :  { %p688_p2 = por %p687_p1, %p686_p0 }
  0x40   :  { %p689_p3 = pnand %p688_p2, %p682_p13 }
  0x42   :  { %692 = shalt.err (!%p689_p3)
}
  0x43   :  { %59 = dma.hbm_to_vmem [thread:$0]  %s878_s3, 2048, %s54_s7, [#allocation9], %s724_s28, %s724_s28, %s725_s29  }
  0x44   :  { %715 = dma.done.wait [#allocation3], 128  }
  0x45   :  { %716 = vsyncadd [#allocation3], 4294967168 }
  0x46   :  { %717 = dma.done.wait [#allocation6], 2560  }
  0x47   :  { %718 = vsyncadd [#allocation6], 4294964736 }
  0x48   :  { %719 = dma.done.wait [#allocation9], 2048  }
  0x49   :  { %720 = vsyncadd [#allocation9], 4294965248  ;;  %v729_v0 = vmov 0.0|0.0   ;;  %vm730_vm0 = vmmov 0   ;;  %v731_v1 = vmov 0.0   ;;  %v75_v2 = vld [vmem:[#allocation5] sm:$0xff]  ;;  %v175_v52 = vlaneseq }
  0x4a   :  { %537 = vmatprep.subr.bf16.mxu0 %v729_v0  ;;  %464 = vmatprep.mubr.msk.f32.mxu0 %vm730_vm0, %v731_v1  ;;  %v76_v3 = vld [vmem:[#allocation5 + $0x8] sm:$0xff]  ;;  %v77_v4 = vld [vmem:[#allocation5 + $0x10] sm:$0xff]  ;;  %v78_v6 = vld [vmem:[#allocation5 + $0x18] sm:$0xff]  ;;  %vm81_vm1 = vcmask 261120   ;;  %s732_s23 = smov [#allocation10]  }
  0x4b   :  { %543 = vmatprep.subr.bf16.mxu1 %v729_v0  ;;  %499 = vmatprep.mubr.msk.f32.mxu1 %vm730_vm0, %v731_v1  ;;  %v538_v5 = vpack.c.bf16 %v76_v3, %v75_v2  ;;  %v541_v7 = vpack.c.bf16 %v78_v6, %v77_v4  ;;  %v74_v8 = vld [vmem:[#allocation2] sm:$0xff]  ;;  %v186_v9 = vld [vmem:[#allocation7] sm:$0xff]  ;;  %v187_v10 = vld [vmem:[#allocation7 + $0x8] sm:$0xff]  ;;  %v834_v53 = vshrl.u32 %v175_v52, 7  ;;  %s402_s24 = sshll.u32 %s732_s23, 4  ;;  %s403_s24 = int_to_ptr.vmem [resolvable:$true] %s402_s24 }
  0x4c   :  { %v544_v11 = vpack.c.bf16 %v187_v10, %v186_v9  ;;  %v188_v12 = vld [vmem:[#allocation7 + $0x10] sm:$0xff]  ;;  %v189_v13 = vld [vmem:[#allocation7 + $0x18] sm:$0xff]  ;;  %v190_v15 = vld [vmem:[#allocation7 + $0x20] sm:$0xff]  ;;  %s693_s25 = scalar_lea.vmem %s403_s24, 128  ;;  %p698_p5 = scmp.lt.s32.totalorder %s403_s24, %s403_s24 }
  0x4d   :  { %539 = vmatpush3.bf16.msra.mxu0 %v538_v5  ;;  %v547_v14 = vpack.c.bf16 %v189_v13, %v188_v12  ;;  %v191_v16 = vld [vmem:[#allocation7 + $0x28] sm:$0xff]  ;;  %v192_v18 = vld [vmem:[#allocation7 + $0x30] sm:$0xff]  ;;  %v193_v19 = vld [vmem:[#allocation7 + $0x38] sm:$0xff]  ;;  %v177_v55 = vsub.s32 0, %v834_v53  ;;  %p694_p4 = scmp.ne.s32.totalorder %s403_s24, %s693_s25  ;;  %p699_p6 = scmp.lt.s32.totalorder %s693_s25, %s693_s25 }
  0x4e   :  { %540 = vmatprep.subr.bf16.mxu0 %v729_v0  ;;  %545 = vmatpush3.bf16.msra.mxu1 %v544_v11  ;;  %v550_v17 = vpack.c.bf16 %v191_v16, %v190_v15  ;;  %v553_v20 = vpack.c.bf16 %v193_v19, %v192_v18  ;;  %v194_v21 = vld [vmem:[#allocation7 + $0x40] sm:$0xff]  ;;  %v195_v22 = vld [vmem:[#allocation7 + $0x48] sm:$0xff]  ;;  %v196_v24 = vld [vmem:[#allocation7 + $0x50] sm:$0xff] }
  0x4f   :  { %546 = vmatprep.subr.bf16.mxu1 %v729_v0  ;;  %v556_v23 = vpack.c.bf16 %v195_v22, %v194_v21  ;;  %v197_v25 = vld [vmem:[#allocation7 + $0x58] sm:$0xff]  ;;  %v198_v27 = vld [vmem:[#allocation7 + $0x60] sm:$0xff]  ;;  %v199_v28 = vld [vmem:[#allocation7 + $0x68] sm:$0xff]  ;;  %p700_p7 = por %p699_p6, %p698_p5 }
  0x50   :  { %v559_v26 = vpack.c.bf16 %v197_v25, %v196_v24  ;;  %v562_v29 = vpack.c.bf16 %v199_v28, %v198_v27  ;;  %v200_v30 = vld [vmem:[#allocation7 + $0x70] sm:$0xff]  ;;  %v201_v31 = vld [vmem:[#allocation7 + $0x78] sm:$0xff]  ;;  %v304_v63 = vld [vmem:[#allocation8] sm:$0xff] }
  0x51   :  { %542 = vmatpush3.bf16.msra.mxu0 %v541_v7  ;;  %v565_v32 = vpack.c.bf16 %v201_v31, %v200_v30  ;;  %v79_v54 = vld [vmem:[%s879_s4] sm:$0x1]  ;;  %v414_v59 = vld [vmem:[%s879_s4 + $0x1] ss:$0 sm:$0xff]  ;;  %v306_v3 = vld [vmem:[#allocation8 + $0x10] sm:$0xff]  ;;  %p701_p8 = pnand %p700_p7, %p694_p4 }
  0x52   :  { %567 = vmatprep.subr.bf16.mxu0 %v729_v0  ;;  %548 = vmatpush3.bf16.msra.mxu1 %v547_v14  ;;  %v307_v4 = vld [vmem:[#allocation8 + $0x18] sm:$0xff]  ;;  %v308_v6 = vld [vmem:[#allocation8 + $0x20] sm:$0xff]  ;;  %v309_v7 = vld [vmem:[#allocation8 + $0x28] sm:$0xff] }
  0x53   :  { %549 = vmatprep.subr.bf16.mxu1 %v729_v0  ;;  %v571_v5 = vpack.c.bf16 %v307_v4, %v306_v3  ;;  %v310_v9 = vld [vmem:[#allocation8 + $0x30] sm:$0xff]  ;;  %v311_v10 = vld [vmem:[#allocation8 + $0x38] sm:$0xff]  ;;  %v312_v12 = vld [vmem:[#allocation8 + $0x40] sm:$0xff] }
  0x54   :  { %465 = vmatmul.mubr.msk.f32.vlgmr.msra.gmra.mrb[0].mxu0 %vm81_vm1, %v74_v8  ;;  %v574_v8 = vpack.c.bf16 %v309_v7, %v308_v6  ;;  %v577_v11 = vpack.c.bf16 %v311_v10, %v310_v9  ;;  %v313_v13 = vld [vmem:[#allocation8 + $0x48] sm:$0xff]  ;;  %v314_v15 = vld [vmem:[#allocation8 + $0x50] sm:$0xff]  ;;  %v315_v16 = vld [vmem:[#allocation8 + $0x58] sm:$0xff] }
  0x55   :  { %534 = vmatprep.mubr.msk.f32.mxu0 %vm730_vm0, %v731_v1  ;;  %v305_v1 = vld [vmem:[#allocation8 + $0x8] sm:$0xff]  ;;  %v580_v14 = vpack.c.bf16 %v313_v13, %v312_v12  ;;  %v316_v18 = vld [vmem:[#allocation8 + $0x60] sm:$0xff]  ;;  %v318_v21 = vld [vmem:[#allocation8 + $0x70] sm:$0xff] }
  0x56   :  { %551 = vmatpush3.bf16.msra.mxu1 %v550_v17  ;;  %v568_v2 = vpack.c.bf16 %v305_v1, %v304_v63  ;;  %v583_v17 = vpack.c.bf16 %v315_v16, %v314_v15  ;;  %v317_v19 = vld [vmem:[#allocation8 + $0x68] sm:$0xff]  ;;  %v319_v22 = vld [vmem:[#allocation8 + $0x78] sm:$0xff] }
  0x57   :  { %552 = vmatprep.subr.bf16.mxu1 %v729_v0 }
  0x58   :  { %569 = vmatpush3.bf16.msra.mxu0 %v568_v2 }
  0x59   :  { %570 = vmatprep.subr.bf16.mxu0 %v729_v0 }
  0x5a   :  { %554 = vmatpush3.bf16.msra.mxu1 %v553_v20  ;;  %v586_v20 = vpack.c.bf16 %v317_v19, %v316_v18 }
  0x5b   :  { %555 = vmatprep.subr.bf16.mxu1 %v729_v0 }
  0x5c   :  { %572 = vmatpush3.bf16.msra.mxu0 %v571_v5 }
  0x5d   :  { %573 = vmatprep.subr.bf16.mxu0 %v729_v0 }
  0x5e   :  { %557 = vmatpush3.bf16.msra.mxu1 %v556_v23  ;;  %v589_v23 = vpack.c.bf16 %v319_v22, %v318_v21 }
  0x5f   :  { %558 = vmatprep.subr.bf16.mxu1 %v729_v0 }
  0x60   :  { %575 = vmatpush3.bf16.msra.mxu0 %v574_v8 }
  0x61   :  { %576 = vmatprep.subr.bf16.mxu0 %v729_v0 }
  0x62   :  { %560 = vmatpush3.bf16.msra.mxu1 %v559_v26 }
  0x63   :  { %561 = vmatprep.subr.bf16.mxu1 %v729_v0 }
  0x64   :  { %578 = vmatpush3.bf16.msra.mxu0 %v577_v11 }
  0x65   :  { %579 = vmatprep.subr.bf16.mxu0 %v729_v0 }
  0x66   :  { %563 = vmatpush3.bf16.msra.mxu1 %v562_v29 }
  0x67   :  { %564 = vmatprep.subr.bf16.mxu1 %v729_v0 }
  0x68   :  { %581 = vmatpush3.bf16.msra.mxu0 %v580_v14 }
  0x69   :  { %582 = vmatprep.subr.bf16.mxu0 %v729_v0 }
  0x6a   :  { %566 = vmatpush3.bf16.msra.mxu1 %v565_v32 }
  0x6c   :  { %584 = vmatpush3.bf16.msra.mxu0 %v583_v17 }
  0x6d   :  { %585 = vmatprep.subr.bf16.mxu0 %v729_v0 }
  0x70   :  { %587 = vmatpush3.bf16.msra.mxu0 %v586_v20 }
  0x71   :  { %588 = vmatprep.subr.bf16.mxu0 %v729_v0 }
  0x74   :  { %590 = vmatpush3.bf16.msra.mxu0 %v589_v23 }
 0x127   :  { %v151_v33 = vpop.f32.mrb[0].mxu0 }
 0x128   :  { %v155_v34 = vrot.slane %v151_v33, 4  ;;  %v466_v35 = vpop.f32.mrb[1].mxu0 }
 0x12a   :  { %v156_v36 = vadd.f32 %v155_v34, %v151_v33 }
 0x12c   :  { %v157_v37 = vrot.slane %v156_v36, 2 }
 0x12e   :  { %v158_v38 = vadd.f32 %v157_v37, %v156_v36 }
 0x130   :  { %v159_v39 = vrot.slane %v158_v38, 1 }
 0x132   :  { %v160_v40 = vadd.f32 %v159_v39, %v158_v38 }
 0x134   :  { %v162_v41 = vmul.f32 0.125, %v160_v40 }
 0x136   :  { %v163_v42 = vsub.f32 %v151_v33, %v162_v41 }
 0x138   :  { %v164_v43 = vmul.f32 %v163_v42, %v163_v42 }
 0x13a   :  { %v165_v44 = vrot.slane %v164_v43, 4 }
 0x13c   :  { %v166_v45 = vadd.f32 %v165_v44, %v164_v43 }
 0x13e   :  { %v167_v46 = vrot.slane %v166_v45, 2 }
 0x140   :  { %v168_v47 = vadd.f32 %v167_v46, %v166_v45  ;;  %v415_v46 = vld [vmem:[%s879_s4 + $0x3] ss:$0 sm:$0xff] }
 0x142   :  { %v169_v48 = vrot.slane %v168_v47, 1 }
 0x144   :  { %v170_v49 = vadd.f32 %v169_v48, %v168_v47 }
 0x146   :  { %v171_v50 = vmul.f32 0.125, %v170_v49 }
 0x148   :  { %v172_v51 = vadd.f32 1e-05, %v171_v50  ;;  %v416_v50 = vld [vmem:[%s879_s4 + $0x4] ss:$0 sm:$0xff] }
 0x14a   :  { %601 = vrsqrt.f32 %v172_v51 }
 0x154   :  { %v602_v56 = vpop.eup %601 }
 0x155   :  { %v174_v57 = vmul.f32 %v602_v56, %v79_v54 }
 0x157   :  { %v178_v58 = vrot.slane %v174_v57, %v177_v55 }
 0x159   :  { %v179_v60 = vmul.f32 %v178_v58, %v163_v42  ;;  %v202_v42 = vld [vmem:[%s879_s4 + $0x2] sm:$0x1] }
 0x15b   :  { %v184_v61 = vadd.f32 %v414_v59, %v179_v60 }
 0x15d   :  { %v185_v62 = vmax.f32 %v184_v61, 0.0 }
 0x15f   :  { %500 = vmatmul.mubr.f32.vlgmr.msra.gmra.mrb[0].mxu1 %v185_v62 }
 0x232   :  { %v270_v24 = vpop.f32.mrb[0].mxu1 }
 0x233   :  { %v274_v25 = vrot.slane %v270_v24, 4  ;;  %v501_v26 = vpop.f32.mrb[1].mxu1 }
 0x235   :  { %v275_v27 = vadd.f32 %v274_v25, %v270_v24 }
 0x237   :  { %v276_v28 = vrot.slane %v275_v27, 2 }
 0x239   :  { %v277_v29 = vadd.f32 %v276_v28, %v275_v27 }
 0x23b   :  { %v278_v30 = vrot.slane %v277_v29, 1 }
 0x23d   :  { %v279_v31 = vadd.f32 %v278_v30, %v277_v29 }
 0x23f   :  { %v280_v32 = vmul.f32 0.125, %v279_v31 }
 0x241   :  { %v281_v33 = vsub.f32 %v270_v24, %v280_v32 }
 0x243   :  { %v282_v34 = vmul.f32 %v281_v33, %v281_v33 }
 0x245   :  { %v283_v35 = vrot.slane %v282_v34, 4 }
 0x247   :  { %v284_v36 = vadd.f32 %v283_v35, %v282_v34 }
 0x249   :  { %v285_v37 = vrot.slane %v284_v36, 2 }
 0x24b   :  { %v286_v38 = vadd.f32 %v285_v37, %v284_v36 }
 0x24d   :  { %v287_v0 = vrot.slane %v286_v38, 1 }
 0x24f   :  { %v288_v39 = vadd.f32 %v287_v0, %v286_v38 }
 0x251   :  { %v289_v40 = vmul.f32 0.125, %v288_v39 }
 0x253   :  { %v290_v41 = vadd.f32 1e-05, %v289_v40 }
 0x255   :  { %603 = vrsqrt.f32 %v290_v41 }
 0x25f   :  { %v604_v43 = vpop.eup %603 }
 0x260   :  { %v292_v44 = vmul.f32 %v604_v43, %v202_v42 }
 0x262   :  { %v296_v45 = vrot.slane %v292_v44, %v177_v55 }
 0x264   :  { %v297_v47 = vmul.f32 %v296_v45, %v281_v33 }
 0x266   :  { %v302_v48 = vadd.f32 %v415_v46, %v297_v47 }
 0x268   :  { %v303_v49 = vmax.f32 %v302_v48, 0.0 }
 0x26a   :  { %535 = vmatmul.mubr.f32.vlgmr.msra.gmra.mrb[2].mxu0 %v303_v49 }
 0x33d   :  { %v391_v51 = vpop.f32.mrb[2].mxu0 }
 0x33e   :  { %v392_v52 = vadd.f32 %v416_v50, %v391_v51  ;;  %v536_v54 = vpop.f32.mrb[3].mxu0 }
 0x340   :  { %395 = vst [vmem:[#allocation10] sm:$0xff] %v392_v52 }
 0x341   :  { %704 = shalt.err (!%p701_p8)
}
 0x342   :  { %s705_s0 = scalar_lea.hbm %s880_s5, 128 }
 0x343   :  { %p706_p9 = scmp.ne.s32.totalorder %s880_s5, %s705_s0  ;;  %p709_p10 = scmp.lt.u32.totalorder %s705_s0, %s880_s5 }
 0x345   :  { %p711_p11 = pnand %p709_p10, %p706_p9 }
 0x347   :  { %714 = shalt.err (!%p711_p11)
}
 0x348   :  { %405 = dma.vmem_to_hbm [thread:$0]  %s403_s24, 128, %s880_s5, [#allocation4]  }
 0x349   :  { %721 = dma.done.wait [#allocation4], 128  }
 0x34a   :  { %722 = vsyncadd [#allocation4], 4294967168 }
 0x34b   :  { %409 = vsyncpa [#allocation3], 1 }
 0x34c   :  { %410 = vsyncpa [#allocation6], 1 }
 0x34d   :  { %411 = vsyncpa [#allocation9], 1 }
 0x34e   :  { %412 = vsyncpa [#allocation4], 1 }

</bundles_post_ra>
